<compile_context>
chip_gen: v7x
topology: tpu7x:2x2x1
jax: 0.10.0
libtpu: 0.0.40
codegen_flags: <defaults>
</compile_context>

<pallas_src>
import functools

import jax
import jax.numpy as jnp
from jax import lax
from jax.experimental import pallas as pl
from jax.experimental.pallas import tpu as pltpu

BN_EPS = 1e-5       # nn.BatchNorm1d default eps
NORM_EPS = 1e-12    # F.normalize default eps


def _byol_head_kernel(x_ref, tgt_ref, w1_ref, b1_ref, gamma_ref, beta_ref,
                      w2_ref, b2_ref, loss_ref,
                      sum_ref, sumsq_ref, loss_acc_ref,
                      *, n_valid, tile_n):
    phase = pl.program_id(0)        # 0: batch statistics, 1: apply + loss
    tile = pl.program_id(1)
    row0 = tile * tile_n

    # fc1, recomputed in both phases (cheaper than storing/reloading h via HBM).
    # Native-dtype operands into the MXU, f32 accumulation.
    h = jnp.dot(x_ref[...], w1_ref[...], preferred_element_type=jnp.float32)
    h = h + b1_ref[...].astype(jnp.float32)

    @pl.when(phase == 0)
    def _stats_phase():
        @pl.when(tile == 0)
        def _init():
            sum_ref[...] = jnp.zeros_like(sum_ref)
            sumsq_ref[...] = jnp.zeros_like(sumsq_ref)
            loss_acc_ref[0] = jnp.float32(0.0)

        # Row-validity mask (batch zero-padded up to a multiple of tile_n).
        # Batch-axis reduction done as a matmul so it rides the MXU.
        vrow = ((row0 + lax.broadcasted_iota(jnp.int32, (1, tile_n), 1))
                < n_valid).astype(jnp.float32)                     # [1, tile_n]
        sum_ref[...] += jnp.dot(vrow, h, preferred_element_type=jnp.float32)
        sumsq_ref[...] += jnp.dot(vrow, h * h,
                                  preferred_element_type=jnp.float32)

    @pl.when(phase == 1)
    def _apply_phase():
        inv_n = jnp.float32(1.0 / n_valid)
        mean = sum_ref[...] * inv_n
        # One-pass biased batch variance E[h^2] - E[h]^2 (BatchNorm1d training).
        var = jnp.maximum(sumsq_ref[...] * inv_n - mean * mean, 0.0)
        scale = lax.rsqrt(var + BN_EPS) * gamma_ref[...].astype(jnp.float32)
        shift = beta_ref[...].astype(jnp.float32)

        hn = jnp.maximum((h - mean) * scale + shift, 0.0)          # BN + ReLU
        pred = jnp.dot(hn, w2_ref[...], preferred_element_type=jnp.float32)
        pred = pred + b2_ref[...].astype(jnp.float32)

        tgt = tgt_ref[...].astype(jnp.float32)
        # Fused F.normalize + dot: per-row reductions + EUP rsqrt; no [N, C]
        # normalized temporaries.
        row_dot = jnp.sum(pred * tgt, axis=1, keepdims=True)
        row_ss_p = jnp.sum(pred * pred, axis=1, keepdims=True)
        row_ss_t = jnp.sum(tgt * tgt, axis=1, keepdims=True)
        eps_sq = jnp.float32(NORM_EPS * NORM_EPS)
        contrib = (row_dot
                   * lax.rsqrt(jnp.maximum(row_ss_p, eps_sq))
                   * lax.rsqrt(jnp.maximum(row_ss_t, eps_sq)))     # [tile_n, 1]

        valid = ((row0 + lax.broadcasted_iota(jnp.int32, (tile_n, 1), 0))
                 < n_valid)
        contrib = jnp.where(valid, contrib, 0.0)

        loss_acc_ref[0] += jnp.sum(contrib)

        @pl.when(tile == pl.num_programs(1) - 1)
        def _finalize():
            loss_ref[0, 0] = -2.0 * loss_acc_ref[0] / n_valid


def latent_predict_head(x, target, w1, b1, gamma, beta, w2, b2, *,
                        max_tile_n=256):
    """BYOL LatentPredictHead forward: returns the scalar loss (size_average)."""
    n, c_in = x.shape
    _, c_out = target.shape
    hid = w1.shape[1]

    # Batch tile: multiple of 8 sublanes, capped at max_tile_n; zero-pad N up.
    n_pad8 = ((n + 7) // 8) * 8
    tn = min(max_tile_n, n_pad8)
    n_padded = ((n + tn - 1) // tn) * tn
    if n_padded != n:
        x = jnp.pad(x, ((0, n_padded - n), (0, 0)))
        target = jnp.pad(target, ((0, n_padded - n), (0, 0)))
    num_tiles = n_padded // tn

    kernel = functools.partial(_byol_head_kernel, n_valid=n, tile_n=tn)

    resident = lambda shape: pl.BlockSpec(shape, lambda p, i: (0, 0))

    loss = pl.pallas_call(
        kernel,
        out_shape=jax.ShapeDtypeStruct((1, 1), jnp.float32),
        grid_spec=pltpu.PrefetchScalarGridSpec(
            num_scalar_prefetch=0,
            grid=(2, num_tiles),                         # (phase, batch tile)
            in_specs=[
                pl.BlockSpec((tn, c_in), lambda p, i: (i, 0)),    # x tile
                # target is only read in phase 1; constant block in phase 0
                # so Pallas skips its DMAs during the stats pass.
                pl.BlockSpec((tn, c_out), lambda p, i: (p * i, 0)),
                resident((c_in, hid)),       # w1  (VMEM-resident)
                resident((1, hid)),          # b1
                resident((1, hid)),          # gamma
                resident((1, hid)),          # beta
                resident((hid, c_out)),      # w2
                resident((1, c_out)),        # b2
            ],
            out_specs=pl.BlockSpec(memory_space=pltpu.MemorySpace.SMEM),
            scratch_shapes=[
                pltpu.VMEM((1, hid), jnp.float32),   # sum_b h
                pltpu.VMEM((1, hid), jnp.float32),   # sum_b h^2
                pltpu.SMEM((1,), jnp.float32),       # loss accumulator
            ],
        ),
        # Both axes must stay "arbitrary": phase 1 depends on phase 0, and the
        # batch tiles accumulate into shared scratch.
        # TODO(synk): per-core partial sum/sumsq + a final reduce would allow
        # marking the tile axis "parallel" for v7x megacore sharding.
        compiler_params=pltpu.CompilerParams(
            dimension_semantics=("arbitrary", "arbitrary")),
    )(x, target, w1, b1, gamma, beta, w2, b2)
    return loss[0, 0]


def _reference(x, target, w1, b1, gamma, beta, w2, b2):
    x = x.astype(jnp.float32)
    h = x @ w1.astype(jnp.float32) + b1
    mean = h.mean(0, keepdims=True)
    var = ((h - mean) ** 2).mean(0, keepdims=True)
    h = (h - mean) / jnp.sqrt(var + BN_EPS) * gamma + beta
    h = jnp.maximum(h, 0.0)
    pred = h @ w2.astype(jnp.float32) + b2
    pn = pred / jnp.maximum(jnp.linalg.norm(pred, axis=1, keepdims=True),
                            NORM_EPS)
    t = target.astype(jnp.float32)
    tnrm = t / jnp.maximum(jnp.linalg.norm(t, axis=1, keepdims=True), NORM_EPS)
    return -2.0 * jnp.sum(pn * tnrm) / x.shape[0]


if __name__ == "__main__":
    # Small shapes consistent with NxC BYOL features.
    N, C_IN, HID, C_OUT = 8, 32, 64, 32

    key = jax.random.PRNGKey(0)
    kx, kt, kw1, kb1, kg, kb, kw2, kb2 = jax.random.split(key, 8)

    x = jax.random.normal(kx, (N, C_IN), dtype=jnp.float32)
    target = jax.random.normal(kt, (N, C_OUT), dtype=jnp.float32)

    # Predictor params (init_linear='normal'-style weights, non-trivial biases
    # / BN affine so every path is exercised).
    w1 = 0.01 * jax.random.normal(kw1, (C_IN, HID), dtype=jnp.float32)
    b1 = 0.1 * jax.random.normal(kb1, (1, HID), dtype=jnp.float32)
    gamma = 1.0 + 0.1 * jax.random.normal(kg, (1, HID), dtype=jnp.float32)
    beta = 0.1 * jax.random.normal(kb, (1, HID), dtype=jnp.float32)
    w2 = 0.01 * jax.random.normal(kw2, (HID, C_OUT), dtype=jnp.float32)
    b2 = 0.1 * jax.random.normal(kb2, (1, C_OUT), dtype=jnp.float32)

    loss = latent_predict_head(x, target, w1, b1, gamma, beta, w2, b2)
    jax.block_until_ready(loss)
    ref = _reference(x, target, w1, b1, gamma, beta, w2, b2)
    assert jnp.allclose(loss, ref, rtol=1e-5, atol=1e-5), (loss, ref)

    # Second check: N not a multiple of the tile -> exercises the multi-tile
    # grid, zero-pad masking, cross-tile BN / loss accumulation, and the
    # phase-dependent target index_map.
    N2 = 20
    x2 = jax.random.normal(kx, (N2, C_IN), dtype=jnp.float32)
    t2 = jax.random.normal(kt, (N2, C_OUT), dtype=jnp.float32)
    loss2 = latent_predict_head(x2, t2, w1, b1, gamma, beta, w2, b2,
                                max_tile_n=8)
    jax.block_until_ready(loss2)
    ref2 = _reference(x2, t2, w1, b1, gamma, beta, w2, b2)
    assert jnp.allclose(loss2, ref2, rtol=1e-5, atol=1e-5), (loss2, ref2)

    print("KERNEL_OK")
</pallas_src>

<mosaic_0001>
module attributes {stable_mosaic.version = 11 : i64} {
  func.func @_byol_head_kernel(%arg0: i32, %arg1: i32, %arg2: memref<8x32xf32, #tpu.memory_space<vmem>>, %arg3: memref<8x32xf32, #tpu.memory_space<vmem>>, %arg4: memref<32x64xf32, #tpu.memory_space<vmem>>, %arg5: memref<1x64xf32, #tpu.memory_space<vmem>>, %arg6: memref<1x64xf32, #tpu.memory_space<vmem>>, %arg7: memref<1x64xf32, #tpu.memory_space<vmem>>, %arg8: memref<64x32xf32, #tpu.memory_space<vmem>>, %arg9: memref<1x32xf32, #tpu.memory_space<vmem>>, %arg10: memref<1x1xf32, #tpu.memory_space<smem>>, %arg11: memref<1x64xf32, #tpu.memory_space<vmem>>, %arg12: memref<1x64xf32, #tpu.memory_space<vmem>>, %arg13: memref<1xf32, #tpu.memory_space<smem>>) attributes {dimension_semantics = [#tpu.dimension_semantics<arbitrary>, #tpu.dimension_semantics<arbitrary>], iteration_bounds = array<i64: 2, 1>, scalar_prefetch = 0 : i64, scratch_operands = 3 : i64, tpu.core_type = #tpu.core_type<tc>, window_params = [{transform_indices = @transform_0, window_bounds = array<i64: 8, 32>}, {transform_indices = @transform_1, window_bounds = array<i64: 8, 32>}, {pipeline_mode = #tpu.pipeline_mode<synchronous>, transform_indices = @transform_2, window_bounds = array<i64: 32, 64>}, {pipeline_mode = #tpu.pipeline_mode<synchronous>, transform_indices = @transform_3, window_bounds = array<i64: 1, 64>}, {pipeline_mode = #tpu.pipeline_mode<synchronous>, transform_indices = @transform_4, window_bounds = array<i64: 1, 64>}, {pipeline_mode = #tpu.pipeline_mode<synchronous>, transform_indices = @transform_5, window_bounds = array<i64: 1, 64>}, {pipeline_mode = #tpu.pipeline_mode<synchronous>, transform_indices = @transform_6, window_bounds = array<i64: 64, 32>}, {pipeline_mode = #tpu.pipeline_mode<synchronous>, transform_indices = @transform_7, window_bounds = array<i64: 1, 32>}, {transform_indices = @transform_8, window_bounds = array<i64: 1, 1>}]} {
    %c8_i32 = arith.constant 8 : i32
    %0 = arith.muli %arg1, %c8_i32 : i32
    %c0 = arith.constant 0 : index
    %c0_0 = arith.constant 0 : index
    %1 = vector.load %arg2[%c0, %c0_0] : memref<8x32xf32, #tpu.memory_space<vmem>>, vector<8x32xf32>
    %c0_1 = arith.constant 0 : index
    %c0_2 = arith.constant 0 : index
    %2 = vector.load %arg4[%c0_1, %c0_2] : memref<32x64xf32, #tpu.memory_space<vmem>>, vector<32x64xf32>
    %cst = arith.constant dense<0.000000e+00> : vector<8x64xf32>
    %3 = tpu.matmul %1, %2, %cst {dimension_numbers = #tpu.dot_dimension_numbers<[1], [0], [0], [1], [0, 0, 1, 1], [], []>} : vector<8x32xf32>, vector<32x64xf32>, vector<8x64xf32> -> vector<8x64xf32>
    %c0_3 = arith.constant 0 : index
    %c0_4 = arith.constant 0 : index
    %4 = vector.load %arg5[%c0_3, %c0_4] : memref<1x64xf32, #tpu.memory_space<vmem>>, vector<1x64xf32>
    %5 = vector.broadcast %4 : vector<1x64xf32> to vector<8x64xf32>
    %6 = arith.addf %3, %5 : vector<8x64xf32>
    %c0_i32 = arith.constant 0 : i32
    %7 = arith.cmpi eq, %arg0, %c0_i32 : i32
    %8 = arith.extui %7 : i1 to i32
    %c0_i32_5 = arith.constant 0 : i32
    %9 = arith.cmpi ne, %8, %c0_i32_5 : i32
    scf.if %9 {
      %c0_i32_7 = arith.constant 0 : i32
      %13 = arith.cmpi eq, %arg1, %c0_i32_7 : i32
      %14 = arith.extui %13 : i1 to i32
      %c0_i32_8 = arith.constant 0 : i32
      %15 = arith.cmpi ne, %14, %c0_i32_8 : i32
      scf.if %15 {
        %cst_20 = arith.constant 0.000000e+00 : f32
        %32 = vector.broadcast %cst_20 : f32 to vector<1x64xf32>
        %c0_21 = arith.constant 0 : index
        %c0_22 = arith.constant 0 : index
        %33 = vector.load %arg11[%c0_21, %c0_22] : memref<1x64xf32, #tpu.memory_space<vmem>>, vector<1x64xf32>
        tpu.vector_store %arg11[%c0_21, %c0_22], %32 {strides = array<i32>} : memref<1x64xf32, #tpu.memory_space<vmem>>, vector<1x64xf32>,
        %cst_23 = arith.constant 0.000000e+00 : f32
        %34 = vector.broadcast %cst_23 : f32 to vector<1x64xf32>
        %c0_24 = arith.constant 0 : index
        %c0_25 = arith.constant 0 : index
        %35 = vector.load %arg12[%c0_24, %c0_25] : memref<1x64xf32, #tpu.memory_space<vmem>>, vector<1x64xf32>
        tpu.vector_store %arg12[%c0_24, %c0_25], %34 {strides = array<i32>} : memref<1x64xf32, #tpu.memory_space<vmem>>, vector<1x64xf32>,
        %cst_26 = arith.constant 0.000000e+00 : f32
        %c0_27 = arith.constant 0 : index
        %36 = memref.load %arg13[%c0_27] : memref<1xf32, #tpu.memory_space<smem>>
        memref.store %cst_26, %arg13[%c0_27] : memref<1xf32, #tpu.memory_space<smem>>
      } else {
      }
      %16 = tpu.iota {dimensions = array<i32: 1>} : vector<1x8xi32>
      %17 = vector.broadcast %0 : i32 to vector<1x8xi32>
      %18 = arith.addi %17, %16 : vector<1x8xi32>
      %c8_i32_9 = arith.constant 8 : i32
      %19 = vector.broadcast %c8_i32_9 : i32 to vector<1x8xi32>
      %20 = arith.cmpi slt, %18, %19 : vector<1x8xi32>
      %21 = arith.extui %20 : vector<1x8xi1> to vector<1x8xi32>
      %22 = arith.sitofp %21 : vector<1x8xi32> to vector<1x8xf32>
      %c0_10 = arith.constant 0 : index
      %c0_11 = arith.constant 0 : index
      %23 = vector.load %arg11[%c0_10, %c0_11] : memref<1x64xf32, #tpu.memory_space<vmem>>, vector<1x64xf32>
      %cst_12 = arith.constant dense<0.000000e+00> : vector<1x64xf32>
      %24 = tpu.matmul %22, %6, %cst_12 {dimension_numbers = #tpu.dot_dimension_numbers<[1], [0], [0], [1], [0, 0, 1, 1], [], []>} : vector<1x8xf32>, vector<8x64xf32>, vector<1x64xf32> -> vector<1x64xf32>
      %25 = arith.addf %23, %24 : vector<1x64xf32>
      %c0_13 = arith.constant 0 : index
      %c0_14 = arith.constant 0 : index
      %26 = vector.load %arg11[%c0_13, %c0_14] : memref<1x64xf32, #tpu.memory_space<vmem>>, vector<1x64xf32>
      tpu.vector_store %arg11[%c0_13, %c0_14], %25 {strides = array<i32>} : memref<1x64xf32, #tpu.memory_space<vmem>>, vector<1x64xf32>,
      %c0_15 = arith.constant 0 : index
      %c0_16 = arith.constant 0 : index
      %27 = vector.load %arg12[%c0_15, %c0_16] : memref<1x64xf32, #tpu.memory_space<vmem>>, vector<1x64xf32>
      %28 = arith.mulf %6, %6 : vector<8x64xf32>
      %cst_17 = arith.constant dense<0.000000e+00> : vector<1x64xf32>
      %29 = tpu.matmul %22, %28, %cst_17 {dimension_numbers = #tpu.dot_dimension_numbers<[1], [0], [0], [1], [0, 0, 1, 1], [], []>} : vector<1x8xf32>, vector<8x64xf32>, vector<1x64xf32> -> vector<1x64xf32>
      %30 = arith.addf %27, %29 : vector<1x64xf32>
      %c0_18 = arith.constant 0 : index
      %c0_19 = arith.constant 0 : index
      %31 = vector.load %arg12[%c0_18, %c0_19] : memref<1x64xf32, #tpu.memory_space<vmem>>, vector<1x64xf32>
      tpu.vector_store %arg12[%c0_18, %c0_19], %30 {strides = array<i32>} : memref<1x64xf32, #tpu.memory_space<vmem>>, vector<1x64xf32>,
    } else {
    }
    %c1_i32 = arith.constant 1 : i32
    %10 = arith.cmpi eq, %arg0, %c1_i32 : i32
    %11 = arith.extui %10 : i1 to i32
    %c0_i32_6 = arith.constant 0 : i32
    %12 = arith.cmpi ne, %11, %c0_i32_6 : i32
    scf.if %12 {
      %c0_7 = arith.constant 0 : index
      %c0_8 = arith.constant 0 : index
      %13 = vector.load %arg11[%c0_7, %c0_8] : memref<1x64xf32, #tpu.memory_space<vmem>>, vector<1x64xf32>
      %cst_9 = arith.constant 1.250000e-01 : f32
      %14 = vector.broadcast %cst_9 : f32 to vector<1x64xf32>
      %15 = arith.mulf %13, %14 : vector<1x64xf32>
      %c0_10 = arith.constant 0 : index
      %c0_11 = arith.constant 0 : index
      %16 = vector.load %arg12[%c0_10, %c0_11] : memref<1x64xf32, #tpu.memory_space<vmem>>, vector<1x64xf32>
      %cst_12 = arith.constant 1.250000e-01 : f32
      %17 = vector.broadcast %cst_12 : f32 to vector<1x64xf32>
      %18 = arith.mulf %16, %17 : vector<1x64xf32>
      %19 = arith.mulf %15, %15 : vector<1x64xf32>
      %20 = arith.subf %18, %19 : vector<1x64xf32>
      %cst_13 = arith.constant 0.000000e+00 : f32
      %21 = vector.broadcast %cst_13 : f32 to vector<1x64xf32>
      %22 = arith.maximumf %20, %21 : vector<1x64xf32>
      %cst_14 = arith.constant 9.99999974E-6 : f32
      %23 = vector.broadcast %cst_14 : f32 to vector<1x64xf32>
      %24 = arith.addf %22, %23 : vector<1x64xf32>
      %25 = math.rsqrt %24 : vector<1x64xf32>
      %c0_15 = arith.constant 0 : index
      %c0_16 = arith.constant 0 : index
      %26 = vector.load %arg6[%c0_15, %c0_16] : memref<1x64xf32, #tpu.memory_space<vmem>>, vector<1x64xf32>
      %27 = arith.mulf %25, %26 : vector<1x64xf32>
      %c0_17 = arith.constant 0 : index
      %c0_18 = arith.constant 0 : index
      %28 = vector.load %arg7[%c0_17, %c0_18] : memref<1x64xf32, #tpu.memory_space<vmem>>, vector<1x64xf32>
      %29 = vector.broadcast %15 : vector<1x64xf32> to vector<8x64xf32>
      %30 = arith.subf %6, %29 : vector<8x64xf32>
      %31 = vector.broadcast %27 : vector<1x64xf32> to vector<8x64xf32>
      %32 = arith.mulf %30, %31 : vector<8x64xf32>
      %33 = vector.broadcast %28 : vector<1x64xf32> to vector<8x64xf32>
      %34 = arith.addf %32, %33 : vector<8x64xf32>
      %cst_19 = arith.constant 0.000000e+00 : f32
      %35 = vector.broadcast %cst_19 : f32 to vector<8x64xf32>
      %36 = arith.maximumf %34, %35 : vector<8x64xf32>
      %c0_20 = arith.constant 0 : index
      %c0_21 = arith.constant 0 : index
      %37 = vector.load %arg8[%c0_20, %c0_21] : memref<64x32xf32, #tpu.memory_space<vmem>>, vector<64x32xf32>
      %cst_22 = arith.constant dense<0.000000e+00> : vector<8x32xf32>
      %38 = tpu.matmul %36, %37, %cst_22 {dimension_numbers = #tpu.dot_dimension_numbers<[1], [0], [0], [1], [0, 0, 1, 1], [], []>} : vector<8x64xf32>, vector<64x32xf32>, vector<8x32xf32> -> vector<8x32xf32>
      %c0_23 = arith.constant 0 : index
      %c0_24 = arith.constant 0 : index
      %39 = vector.load %arg9[%c0_23, %c0_24] : memref<1x32xf32, #tpu.memory_space<vmem>>, vector<1x32xf32>
      %40 = vector.broadcast %39 : vector<1x32xf32> to vector<8x32xf32>
      %41 = arith.addf %38, %40 : vector<8x32xf32>
      %c0_25 = arith.constant 0 : index
      %c0_26 = arith.constant 0 : index
      %42 = vector.load %arg3[%c0_25, %c0_26] : memref<8x32xf32, #tpu.memory_space<vmem>>, vector<8x32xf32>
      %43 = arith.mulf %41, %42 : vector<8x32xf32>
      %cst_27 = arith.constant dense<0.000000e+00> : vector<8xf32>
      %44 = vector.multi_reduction <add>, %43, %cst_27 [1] : vector<8x32xf32> to vector<8xf32>
      %45 = vector.shape_cast %44 : vector<8xf32> to vector<8x1xf32>
      %46 = arith.mulf %41, %41 : vector<8x32xf32>
      %cst_28 = arith.constant dense<0.000000e+00> : vector<8xf32>
      %47 = vector.multi_reduction <add>, %46, %cst_28 [1] : vector<8x32xf32> to vector<8xf32>
      %48 = vector.shape_cast %47 : vector<8xf32> to vector<8x1xf32>
      %49 = arith.mulf %42, %42 : vector<8x32xf32>
      %cst_29 = arith.constant dense<0.000000e+00> : vector<8xf32>
      %50 = vector.multi_reduction <add>, %49, %cst_29 [1] : vector<8x32xf32> to vector<8xf32>
      %51 = vector.shape_cast %50 : vector<8xf32> to vector<8x1xf32>
      %cst_30 = arith.constant 1.000000e-24 : f32
      %52 = vector.broadcast %cst_30 : f32 to vector<8x1xf32>
      %53 = arith.maximumf %48, %52 : vector<8x1xf32>
      %54 = math.rsqrt %53 : vector<8x1xf32>
      %55 = arith.mulf %45, %54 : vector<8x1xf32>
      %cst_31 = arith.constant 1.000000e-24 : f32
      %56 = vector.broadcast %cst_31 : f32 to vector<8x1xf32>
      %57 = arith.maximumf %51, %56 : vector<8x1xf32>
      %58 = math.rsqrt %57 : vector<8x1xf32>
      %59 = arith.mulf %55, %58 : vector<8x1xf32>
      %60 = tpu.iota {dimensions = array<i32: 0>} : vector<8x1xi32>
      %61 = vector.broadcast %0 : i32 to vector<8x1xi32>
      %62 = arith.addi %61, %60 : vector<8x1xi32>
      %c8_i32_32 = arith.constant 8 : i32
      %63 = vector.broadcast %c8_i32_32 : i32 to vector<8x1xi32>
      %64 = arith.cmpi slt, %62, %63 : vector<8x1xi32>
      %cst_33 = arith.constant 0.000000e+00 : f32
      %65 = vector.broadcast %cst_33 : f32 to vector<8x1xf32>
      %66 = arith.select %64, %59, %65 : vector<8x1xi1>, vector<8x1xf32>
      %c0_34 = arith.constant 0 : index
      %67 = memref.load %arg13[%c0_34] : memref<1xf32, #tpu.memory_space<smem>>
      %68 = vector.shape_cast %66 : vector<8x1xf32> to vector<1x8x1xf32>
      %cst_35 = arith.constant dense<0.000000e+00> : vector<1xf32>
      %69 = vector.multi_reduction <add>, %68, %cst_35 [1, 2] : vector<1x8x1xf32> to vector<1xf32>
      %70 = vector.shape_cast %69 : vector<1xf32> to vector<1x1x1xf32>
      %71 = vector.extract %70[0, 0, 0] : f32 from vector<1x1x1xf32>
      %72 = arith.addf %67, %71 : f32
      %c0_36 = arith.constant 0 : index
      %73 = memref.load %arg13[%c0_36] : memref<1xf32, #tpu.memory_space<smem>>
      memref.store %72, %arg13[%c0_36] : memref<1xf32, #tpu.memory_space<smem>>
      %c0_i32_37 = arith.constant 0 : i32
      %74 = arith.cmpi eq, %arg1, %c0_i32_37 : i32
      %75 = arith.extui %74 : i1 to i32
      %c0_i32_38 = arith.constant 0 : i32
      %76 = arith.cmpi ne, %75, %c0_i32_38 : i32
      scf.if %76 {
        %c0_39 = arith.constant 0 : index
        %77 = memref.load %arg13[%c0_39] : memref<1xf32, #tpu.memory_space<smem>>
        %cst_40 = arith.constant -2.000000e+00 : f32
        %78 = arith.mulf %cst_40, %77 : f32
        %cst_41 = arith.constant 8.000000e+00 : f32
        %79 = arith.divf %78, %cst_41 : f32
        %c0_42 = arith.constant 0 : index
        %c0_43 = arith.constant 0 : index
        %80 = memref.load %arg10[%c0_42, %c0_43] : memref<1x1xf32, #tpu.memory_space<smem>>
        memref.store %79, %arg10[%c0_42, %c0_43] : memref<1x1xf32, #tpu.memory_space<smem>>
      } else {
      }
    } else {
    }
    return
  }
  func.func @transform_0(%arg0: i32, %arg1: i32) -> (i32, i32) {
    %c0_i32 = arith.constant 0 : i32
    %c0_i32_0 = arith.constant 0 : i32
    return %arg1, %c0_i32 : i32, i32
  }
  func.func @transform_1(%arg0: i32, %arg1: i32) -> (i32, i32) {
    %0 = arith.muli %arg0, %arg1 : i32
    %c0_i32 = arith.constant 0 : i32
    %c0_i32_0 = arith.constant 0 : i32
    return %0, %c0_i32 : i32, i32
  }
  func.func @transform_2(%arg0: i32, %arg1: i32) -> (i32, i32) {
    %c0_i32 = arith.constant 0 : i32
    %c0_i32_0 = arith.constant 0 : i32
    %c0_i32_1 = arith.constant 0 : i32
    return %c0_i32, %c0_i32_0 : i32, i32
  }
  func.func @transform_3(%arg0: i32, %arg1: i32) -> (i32, i32) {
    %c0_i32 = arith.constant 0 : i32
    %c0_i32_0 = arith.constant 0 : i32
    %c0_i32_1 = arith.constant 0 : i32
    return %c0_i32, %c0_i32_0 : i32, i32
  }
  func.func @transform_4(%arg0: i32, %arg1: i32) -> (i32, i32) {
    %c0_i32 = arith.constant 0 : i32
    %c0_i32_0 = arith.constant 0 : i32
    %c0_i32_1 = arith.constant 0 : i32
    return %c0_i32, %c0_i32_0 : i32, i32
  }
  func.func @transform_5(%arg0: i32, %arg1: i32) -> (i32, i32) {
    %c0_i32 = arith.constant 0 : i32
    %c0_i32_0 = arith.constant 0 : i32
    %c0_i32_1 = arith.constant 0 : i32
    return %c0_i32, %c0_i32_0 : i32, i32
  }
  func.func @transform_6(%arg0: i32, %arg1: i32) -> (i32, i32) {
    %c0_i32 = arith.constant 0 : i32
    %c0_i32_0 = arith.constant 0 : i32
    %c0_i32_1 = arith.constant 0 : i32
    return %c0_i32, %c0_i32_0 : i32, i32
  }
  func.func @transform_7(%arg0: i32, %arg1: i32) -> (i32, i32) {
    %c0_i32 = arith.constant 0 : i32
    %c0_i32_0 = arith.constant 0 : i32
    %c0_i32_1 = arith.constant 0 : i32
    return %c0_i32, %c0_i32_0 : i32, i32
  }
  func.func @transform_8(%arg0: i32, %arg1: i32) -> (i32, i32) {
    %c0_i32 = arith.constant 0 : i32
    %c0_i32_0 = arith.constant 0 : i32
    %c0_i32_1 = arith.constant 0 : i32
    return %c0_i32, %c0_i32_0 : i32, i32
  }
}

</mosaic_0001>

<bundles_post_ra>
// kernel: tpu_custom_call.1
= control target key start
LH: loop header
LB: loop body
LE: loop exit
PB: predicated region body
PF: predicated region fallthrough
CT: control target
= control target key end

     0   :  { %13 = vsyncpa [#allocation6], 0  ;;  %s1070_s27 = smov 0   ;;  %s1072_s28 = smov 0   ;;  %s1184_s0 = inlined_call_operand.vmem [shape: f32[8,32], index: 0, kind: input, shape index: {}]   ;;  %s1185_s1 = inlined_call_operand.vmem [shape: f32[8,32], index: 1, kind: input, shape index: {}]   ;;  %s1186_s2 = inlined_call_operand.vmem [shape: f32[32,64], index: 2, kind: input, shape index: {}]   ;;  %s1187_s3 = inlined_call_operand.vmem [shape: f32[1,64], index: 3, kind: input, shape index: {}]   ;;  %s1188_s4 = inlined_call_operand.vmem [shape: f32[1,64], index: 4, kind: input, shape index: {}]   ;;  %s1189_s5 = inlined_call_operand.vmem [shape: f32[1,64], index: 5, kind: input, shape index: {}]   ;;  %s1190_s6 = inlined_call_operand.vmem [shape: f32[64,32], index: 6, kind: input, shape index: {}]   ;;  %s1191_s7 = inlined_call_operand.vmem [shape: f32[1,32], index: 7, kind: input, shape index: {}]   ;;  %s1192_s8 = inlined_call_operand.hbm [shape: f32[1,1], index: 8, kind: output, shape index: {}]  }
   0x1   :  { %s1074_s29 = smov 0  }
   0x2 LB: > { %s831_s30 = sadd.s32 4294967295, %s1013_s29   ;;  %s31_s9 = sadd.s32 1, %s1009_s28  ;;  %s1013_s29 = sphi %s1074_s29, %s19_s29   ;;  %s1009_s28 = sphi %s1072_s28, %s1194_s28   ;;  %s1005_s27 = sphi %s1070_s27, %s1193_s27  }
   0x3   : > { %p33_p0 = scmp.ge.s32.totalorder %s31_s9, 2  ;;  %p836_p1 = scmp.ge.s32.totalorder %s1013_s29, 1 }
   0x4   : > { %p282_p2 = scmp.lt.s32.totalorder %s1013_s29, 3 }
   0x5   : > { %s1196_s9 = smov (%p33_p0, %s31_s9), 0 }
   0x6   : > { %p283_p3 = pnand %p836_p1, %p282_p2 }
   0x7   : > { %v327_v0 = vld [vmem:[%s1186_s2] sm:$0xff] (!%p283_p3)  ;;  %v328_v1 = vld [vmem:[%s1186_s2 + $0x8] sm:$0xff] (!%p283_p3)  ;;  %v329_v2 = vld [vmem:[%s1186_s2 + $0x10] sm:$0xff] (!%p283_p3)  ;;  %v1015_v3 = vmov (!%p283_p3), 0.0|0.0   ;;  %vm1016_vm0 = vmmov (!%p283_p3), 0   ;;  %v1017_v6 = vmov (!%p283_p3), 0.0  }
   0x8   : > { %286 = sbr.rel (%p283_p3) target bundleno = 1090 (0x442), region = 52  ;;  %909 = vmatprep.subr.bf16.mxu0 (!%p283_p3), %v1015_v3  ;;  %v910_v4 = vpack.c.bf16 (!%p283_p3), %v328_v1, %v327_v0  ;;  %v330_v5 = vld [vmem:[%s1186_s2 + $0x18] sm:$0xff] (!%p283_p3)  ;;  %877 = vmatprep.mubr.msk.f32.mxu0 (!%p283_p3), %vm1016_vm0, %v1017_v6  ;;  %v326_v8 = vld [vmem:[%s1184_s0] sm:$0xff] (!%p283_p3)  ;;  %vm338_vm1 = vcmask (!%p283_p3), 261120   ;;  %p839_p4 = scmp.ne.s32.totalorder (!%p283_p3), %s1005_s27, 0 }
   0x9   : > { %v913_v7 = vpack.c.bf16 (!%p283_p3), %v330_v5, %v329_v2  ;;  %v837_v9 = vld [vmem:[%s1187_s3] ss:$0 sm:$0xff] (!%p283_p3) }
   0xa   : > { %911 = vmatpush3.bf16.msra.mxu0 (!%p283_p3), %v910_v4 }
   0xb   : > { %912 = vmatprep.subr.bf16.mxu0 (!%p283_p3), %v1015_v3 }
   0xe   : > { %914 = vmatpush3.bf16.msra.mxu0 (!%p283_p3), %v913_v7 }
   0xf   : > { %v425_v14 = vlaneseq (!%p839_p4)  ;;  %s1018_s22 = smov (!%p839_p4), 0.0   ;;  %v1019_v15 = vmov (!%p839_p4), 0.0   ;;  %vm420_vm2 = vcmask (!%p839_p4), 516096   ;;  %vm1020_vm3 = vmmov (!%p839_p4), 0  }
  0x10   : > { %424 = sst [smem:[#allocation4]] (!%p839_p4), %s1018_s22  ;;  %880 = vmatprep.subr.mxu0 (!%p839_p4), %v1019_v15  ;;  %885 = vmatprep.subr.mxu1 (!%p839_p4), %v1019_v15  ;;  %421 = vst.msk [vmem:[#allocation2] sm:$0x1] (!%p839_p4), %vm420_vm2, %v1019_v15  ;;  %422 = vst.msk [vmem:[#allocation3] sm:$0x1] (!%p839_p4), %vm420_vm2, %v1019_v15  ;;  %vm433_vm4 = vcmask (!%p839_p4), 64512  }
  0x11   : > { %878 = vmatmul.mubr.msk.f32.vlgmr.msra.gmra.mrb[0].mxu0 %vm338_vm1, %v326_v8  ;;  %v426_v16 = vand.u32 (!%p839_p4), 127, %v425_v14  ;;  %887 = vmatprep.mubr.msk.f32.mxu1 (!%p839_p4), %vm1020_vm3, %v1019_v15 }
  0x12   : > { %882 = vmatprep.mubr.msk.f32.mxu0 (!%p839_p4), %vm1020_vm3, %v1019_v15 }
  0x13   : > { %vm429_vm5 = vcmp.lt.s32.totalorder (!%p839_p4), %v426_v16, 8 }
  0x14   : > { %v840_v17 = vsel (!%p839_p4), %vm429_vm5, 1.0, %v1019_v15 }
  0x17   : > { %v432_v18 = vld [vmem:[#allocation2] sm:$0x1] (!%p839_p4)  ;;  %v510_v19 = vld [vmem:[#allocation3] sm:$0x1] (!%p839_p4) }
  0xdf   : > { %415 = sbr.rel (%p839_p4) target bundleno = 449 (0x1c1), region = 56 }
  0xe4   : > { %v408_v10 = vpop.f32.mrb[0].mxu0 }
  0xe5   : > { %v1110_v11 = vadd.f32 %v837_v9, %v408_v10  ;;  %v879_v12 = vpop.f32.mrb[1].mxu0 }
  0xe7   : > { %v511_v13 = vmul.f32 %v1110_v11, %v1110_v11  ;;  %881 = vmatpush3.msra.mxu0 %v1110_v11 }
  0xe8   : > { %883 = vmatmul.mubr.msk.f32.vlgmr.msra.gmra.mrb[0].mxu0 %vm433_vm4, %v840_v17 }
  0xe9   : > { %886 = vmatpush3.msra.mxu1 %v511_v13 }
  0xea   : > { %888 = vmatmul.mubr.msk.f32.vlgmr.msra.gmra.mrb[0].mxu1 %vm433_vm4, %v840_v17 }
 0x1bb   : > { %v503_v20 = vpop.f32.mrb[0].mxu0 }
 0x1bc   : > { %v507_v22 = vadd.f32 %v503_v20, %v432_v18  ;;  %v884_v24 = vpop.f32.mrb[1].mxu0 }
 0x1bd   : > { %v578_v21 = vpop.f32.mrb[0].mxu1 }
 0x1be   : > { %v582_v23 = vadd.f32 %v578_v21, %v510_v19  ;;  %v889_v25 = vpop.f32.mrb[1].mxu1  ;;  %509 = vst.msk [vmem:[#allocation2] sm:$0x1] %vm420_vm2, %v507_v22 }
 0x1c0   : > { %583 = vst.msk [vmem:[#allocation3] sm:$0x1] %vm420_vm2, %v582_v23 }
 0x1c1 PF: > { %p843_p5 = scmp.ne.s32.totalorder %s1005_s27, 1 }
 0x1c2   : > { %v622_v26 = vld [vmem:[%s1190_s6] sm:$0xff] (!%p843_p5)  ;;  %v623_v27 = vld [vmem:[%s1190_s6 + $0x8] sm:$0xff] (!%p843_p5)  ;;  %v624_v28 = vld [vmem:[%s1190_s6 + $0x10] sm:$0xff] (!%p843_p5)  ;;  %v1021_v29 = vmov (!%p843_p5), 0.0|0.0   ;;  %vm1022_vm6 = vmmov (!%p843_p5), 0   ;;  %v1023_v32 = vmov (!%p843_p5), 0.0   ;;  %v601_v45 = vlaneseq (!%p843_p5) }
 0x1c3   : > { %587 = sbr.rel (%p843_p5) target bundleno = 1075 (0x433), region = 64  ;;  %915 = vmatprep.subr.bf16.mxu0 (!%p843_p5), %v1021_v29  ;;  %v916_v30 = vpack.c.bf16 (!%p843_p5), %v623_v27, %v622_v26  ;;  %v625_v31 = vld [vmem:[%s1190_s6 + $0x18] sm:$0xff] (!%p843_p5)  ;;  %906 = vmatprep.mubr.msk.f32.mxu0 (!%p843_p5), %vm1022_vm6, %v1023_v32  ;;  %v626_v37 = vld [vmem:[%s1190_s6 + $0x20] sm:$0xff] (!%p843_p5)  ;;  %v627_v38 = vld [vmem:[%s1190_s6 + $0x28] sm:$0xff] (!%p843_p5)  ;;  %vm637_vm7 = vcmask (!%p843_p5), 523264   ;;  %vm737_vm8 = vcmask (!%p843_p5), 7168  }
 0x1c4   : > { %v919_v34 = vpack.c.bf16 (!%p843_p5), %v625_v31, %v624_v28  ;;  %v922_v41 = vpack.c.bf16 (!%p843_p5), %v627_v38, %v626_v37  ;;  %v628_v43 = vld [vmem:[%s1190_s6 + $0x30] sm:$0xff] (!%p843_p5)  ;;  %v629_v44 = vld [vmem:[%s1190_s6 + $0x38] sm:$0xff] (!%p843_p5)  ;;  %v602_v49 = vshrl.u32 (!%p843_p5), %v601_v45, 7  ;;  %v597_v52 = vld [vmem:[%s1188_s4] sm:$0x1] (!%p843_p5)  ;;  %s736_s12 = sld [smem:[#allocation4]] (!%p843_p5) }
 0x1c5   : > { %v588_v33 = vld [vmem:[#allocation2] sm:$0x1] (!%p843_p5)  ;;  %917 = vmatpush3.bf16.msra.mxu0 (!%p843_p5), %v916_v30  ;;  %v925_v47 = vpack.c.bf16 (!%p843_p5), %v629_v44, %v628_v43 }
 0x1c6   : > { %v589_v35 = vmul.f32 (!%p843_p5), 0.125, %v588_v33  ;;  %918 = vmatprep.subr.bf16.mxu0 (!%p843_p5), %v1021_v29  ;;  %v603_v50 = vsub.s32 (!%p843_p5), 0, %v602_v49  ;;  %v844_v57 = vld [vmem:[%s1189_s5] ss:$0 sm:$0xff] (!%p843_p5) }
 0x1c7   : > { %v590_v36 = vld [vmem:[#allocation3] sm:$0x1] (!%p843_p5)  ;;  %v845_v61 = vld [vmem:[%s1191_s7] ss:$0 sm:$0xff] (!%p843_p5) }
 0x1c8   : > { %v591_v39 = vmul.f32 (!%p843_p5), 0.125, %v590_v36  ;;  %v592_v40 = vmul.f32 (!%p843_p5), %v589_v35, %v589_v35  ;;  %v604_v51 = vrot.slane (!%p843_p5), %v589_v35, %v603_v50  ;;  %v711_v63 = vld [vmem:[%s1185_s1] sm:$0xff] (!%p843_p5) }
 0x1c9   : > { %920 = vmatpush3.bf16.msra.mxu0 (!%p843_p5), %v919_v34  ;;  %v720_v4 = vmul.f32 (!%p843_p5), %v711_v63, %v711_v63 }
 0x1ca   : > { %v593_v42 = vsub.f32 %v591_v39, %v592_v40  ;;  %921 = vmatprep.subr.bf16.mxu0 %v1021_v29  ;;  %v606_v55 = vsub.f32 %v1110_v11, %v604_v51 }
 0x1cb   : > { %v721_v7 = vsel %vm338_vm1, %v720_v4, 0.0 }
 0x1cc   : > { %v594_v46 = vmax.f32 %v593_v42, 0.0 }
 0x1cd   : > { %923 = vmatpush3.bf16.msra.mxu0 %v922_v41 }
 0x1ce   : > { %v595_v48 = vadd.f32 1e-05, %v594_v46  ;;  %924 = vmatprep.subr.bf16.mxu0 %v1021_v29 }
 0x1d0   : > { %969 = vrsqrt.f32 %v595_v48 }
 0x1d1   : > { %926 = vmatpush3.bf16.msra.mxu0 %v925_v47 }
 0x1da   : > { %v970_v53 = vpop.eup %969 }
 0x1db   : > { %v598_v54 = vmul.f32 %v970_v53, %v597_v52 }
 0x1dd   : > { %v611_v56 = vrot.slane %v598_v54, %v603_v50 }
 0x1df   : > { %v613_v58 = vmul.f32 %v611_v56, %v606_v55 }
 0x1e1   : > { %v620_v59 = vadd.f32 %v844_v57, %v613_v58 }
 0x1e3   : > { %v621_v60 = vmax.f32 %v620_v59, 0.0 }
 0x1e5   : > { %907 = vmatmul.mubr.msk.f32.vlgmr.msra.gmra.mrb[0].mxu0 %vm637_vm7, %v621_v60 }
 0x2b8   : > { %v707_v62 = vpop.f32.mrb[0].mxu0 }
 0x2b9   : > { %v708_v0 = vadd.f32 %v845_v61, %v707_v62  ;;  %v908_v1 = vpop.f32.mrb[1].mxu0 }
 0x2bb   : > { %v716_v2 = vmul.f32 %v708_v0, %v708_v0  ;;  %v712_v3 = vmul.f32 %v711_v63, %v708_v0 }
 0x2bd   : > { %v717_v5 = vsel %vm338_vm1, %v716_v2, 0.0  ;;  %v713_v6 = vsel %vm338_vm1, %v712_v3, 0.0 }
 0x2be   : > { %718 = vadd.xlane.f32.xlu0 %v717_v5  ;;  %714 = vadd.xlane.f32.xlu1 %v713_v6 }
 0x2c2   : > { %722 = vadd.xlane.f32.xlu0 %v721_v7 }
 0x34b   : > { %v719_v8 = vpop.xlane.xlu0 %718  ;;  %v715_v13 = vpop.xlane.xlu1 %714 }
 0x34c   : > { %v724_v9 = vmax.f32 %v719_v8, 1e-24 }
 0x34e   : > { %971 = vrsqrt.f32 %v724_v9 }
 0x34f   : > { %v723_v10 = vpop.xlane.xlu0 %722 }
 0x350   : > { %v727_v11 = vmax.f32 %v723_v10, 1e-24 }
 0x352   : > { %973 = vrsqrt.f32 %v727_v11 }
 0x358   : > { %v972_v12 = vpop.eup %971 }
 0x359   : > { %v726_v14 = vmul.f32 %v972_v12, %v715_v13 }
 0x35c   : > { %v974_v15 = vpop.eup %973 }
 0x35d   : > { %v729_v16 = vmul.f32 %v974_v15, %v726_v14 }
 0x35f   : > { %v738_v17 = vsel %vm737_vm8, %v729_v16, 0.0 }
 0x360   : > { %739 = vadd.xlane.f32.xlu1 %v738_v17 }
 0x3ed   : > { %v740_v18 = vpop.xlane.xlu1 %739 }
 0x3ee   : > { %v741_v19 = vrot.slane %v740_v18, 4 }
 0x3f0   : > { %v742_v20 = vadd.f32 %v741_v19, %v740_v18 }
 0x3f2   : > { %v743_v21 = vrot.slane %v742_v20, 2 }
 0x3f4   : > { %v744_v22 = vadd.f32 %v743_v21, %v742_v20 }
 0x3f6   : > { %v745_v23 = vrot.slane %v744_v22, 1 }
 0x3f8   : > { %v746_v24 = vadd.f32 %v745_v23, %v744_v22 }
 0x3fa   : > { %927 = vpush %v746_v24 }
 0x42b   : > { %s928_s13 = spop %927 }
 0x42c   : > { %s748_s27 = sadd.f32 %s928_s13, %s736_s12 }
 0x42e   : > { %750 = sst [smem:[#allocation4]] %s748_s27  ;;  %s756_s14 = smul.f32 -2.0, %s748_s27 }
 0x430   : > { %s759_s15 = smul.f32 0.125, %s756_s14 }
 0x432   : > { %761 = sst [smem:[#allocation5]] %s759_s15 }
 0x433 PF: > { %p933_p6 = scmp.eq.s32.totalorder %s831_s30, 1  ;;  %s975_s18 = scalar_lea.hbm %s1192_s8, 16 }
 0x434   : > { %p976_p7 = scmp.ne.s32.totalorder %s1192_s8, %s975_s18  ;;  %p981_p10 = scmp.lt.u32.totalorder %s975_s18, %s1192_s8 }
 0x436   : > { %p977_p8 = pnand %p976_p7, %p933_p6 }
 0x438   : > { %p978_p9 = pneg %p977_p8 }
 0x43a   : > { %p983_p11 = pnand %p981_p10, %p978_p9 }
 0x43c   : > { %986 = shalt.err (!%p983_p11)
}
 0x43d   : > { %s1024_s23 = smov [#allocation5]  }
 0x43e   : > { %930 = dma.smem_to_hbm (%p933_p6), %s1024_s23, 16, %s1192_s8, [#allocation6]  }
 0x43f   : > { %1000 = dma.done.wait (%p933_p6), [#allocation6], 16  }
 0x440   : > { %1002 = vsyncadd (%p933_p6), [#allocation6], 4294967280 }
 0x441   : > { %775 = sfence }
 0x442 PF: > { %s19_s29 = sadd.s32 1, %s1013_s29   ;;  %s1193_s27 = smov %s1009_s28 }
 0x443   : > { %p16_p12 = scmp.ge.s32.totalorder %s19_s29, 4   ;;  %s1194_s28 = smov %s1196_s9 }
 0x445   :  { %18 = sbr.rel (!%p16_p12) target bundleno = 2 (0x2), region = 101 }
 0x44c   :  { %781 = vsyncpa [#allocation6], 1 }
 0x44d   :  { %783 = vsyncpa [#allocation6 + $0x1], 1 }

</bundles_post_ra>
